<compile_context>
chip_gen: v6e
topology: v6e:2x2x1
jax: 0.10.0
libtpu: 0.0.40
codegen_flags: <defaults>
</compile_context>

<pallas_src>
import functools

import numpy as np
import jax
import jax.numpy as jnp
from jax.experimental import pallas as pl
from jax.experimental.pallas import tpu as pltpu

LANE = 128
OUT_UNARY = 9                        # fixed by DeepEquationLearner.__init__
OUT_BINARY = 10
GROUP = OUT_UNARY // 3               # 3 id / 3 sin / 3 cos
TOTAL_UNITS = OUT_UNARY + 2 * OUT_BINARY      # 29 linear units per EQL layer
HIDDEN_FEATS = OUT_UNARY + OUT_BINARY         # 19 features out of each EQL layer
BIN_LEFT = 16                        # left operands / products at lanes 16..25
BIN_SHIFT = LANE // 2                # right operands at lanes 80..89 (left + 64)


def _round_up(x, m):
    return (x + m - 1) // m * m


def _cdiv(a, b):
    return (a + b - 1) // b


def _default_weight_dtype():
    # bf16 MXU operands pay off on v6e/v7x; keep f32 on v5e (no bf16 VPU/EUP,
    # per-step casts eat the small MXU win on this tiny net).
    try:
        kind = jax.devices()[0].device_kind.lower()
    except Exception:
        return jnp.bfloat16
    if "v5 lite" in kind or "v5lite" in kind or "v5e" in kind:
        return jnp.float32
    return jnp.bfloat16


# ----------------------------------------------------------------------------
# Pallas kernel
# ----------------------------------------------------------------------------
def _deep_eql_kernel(*refs, num_hidden, use_division, division_threshold):
    # refs = (x, w0, b0, w1, b1, ..., w_out, b_out, out)
    x_ref = refs[0]
    out_ref = refs[-1]
    bb = out_ref.shape[0]

    # Hoisted lane masks (JAX does not CSE broadcast_in_dim -> build once).
    lanes = jax.lax.broadcasted_iota(jnp.int32, (bb, LANE), 1)
    id_mask = lanes < GROUP              # lanes 0-2  : identity
    unary_mask = lanes < OUT_UNARY       # lanes 3-8  : sin (cos folded via bias)

    h = x_ref[...]                       # (bb, input_dim) first layer input
    idx = 1
    for _ in range(num_hidden):
        w_ref, b_ref = refs[idx], refs[idx + 1]
        idx += 2
        w = w_ref[...]
        # MXU matmul in the weights' dtype (bf16 on v6e/v7x), f32 accumulation.
        # TODO(synk): first layer has K=input_dim (tiny); a VPU outer-product
        # would avoid a near-empty MXU pass, but it is latency-only here.
        z = jnp.dot(h.astype(w.dtype), w,
                    preferred_element_type=jnp.float32) + b_ref[...]
        # One EUP sin pass; cos columns carry a +pi/2 bias shift (host side).
        s = jnp.sin(z)
        # Binary products: right operands live exactly 64 lanes above the left
        # operands, so a single self-inverse lane rotation aligns the pairs (XLU).
        prod = z * pltpu.roll(z, shift=BIN_SHIFT, axis=1)
        # h lanes 0-2: z, 3-8: sin(z), rest: products (valid at 16-25; garbage
        # elsewhere hits zero weight rows of the next matmul).
        h = jnp.where(id_mask, z, jnp.where(unary_mask, s, prod))   # (bb, LANE)

    wo_ref, bo_ref = refs[idx], refs[idx + 1]
    wo = wo_ref[...]
    out = jnp.dot(h.astype(wo.dtype), wo,
                  preferred_element_type=jnp.float32) + bo_ref[...]

    if use_division:
        num = out[:, :LANE]
        den = out[:, LANE:]
        # EUP approximate reciprocal + one Newton step (slack VALU) -> ~f32 acc.
        inv = pl.reciprocal(den, approx=True)
        inv = inv * (2.0 - den * inv)
        # den == 0 on padded lanes gives Inf/NaN transiently; discarded by the
        # select below (no FP traps on TPU, padded lanes never consumed).
        out = jnp.where(jnp.abs(den) > division_threshold, num * inv,
                        jnp.zeros_like(num))

    out_ref[...] = out                   # lane-dense (bb, 128) store


# ----------------------------------------------------------------------------
# Parameter construction / padding (plain-JAX glue)
# ----------------------------------------------------------------------------
def init_params(key, input_dim, hidden_layers, output_dim, use_division):
    """Logical (un-padded) parameters, PyTorch-Linear-like uniform init."""
    params = {"hidden": []}
    in_feat = input_dim
    for _ in range(hidden_layers):
        key, kw, kb = jax.random.split(key, 3)
        bound = 1.0 / np.sqrt(in_feat)
        W = jax.random.uniform(kw, (in_feat, TOTAL_UNITS), jnp.float32, -bound, bound)
        b = jax.random.uniform(kb, (TOTAL_UNITS,), jnp.float32, -bound, bound)
        params["hidden"].append((W, b))
        in_feat = HIDDEN_FEATS
    key, kw, kb = jax.random.split(key, 3)
    out_cols = 2 * output_dim if use_division else output_dim
    bound = 1.0 / np.sqrt(in_feat)
    params["Wout"] = jax.random.uniform(kw, (in_feat, out_cols), jnp.float32, -bound, bound)
    params["bout"] = jax.random.uniform(kb, (out_cols,), jnp.float32, -bound, bound)
    return params


def _z_col_map():
    """logical linear-output column -> padded lane (single 128-lane block)."""
    cols = np.zeros(TOTAL_UNITS, dtype=np.int32)
    cols[:OUT_UNARY] = np.arange(OUT_UNARY)                     # id 0-2 | sin 3-5 | cos 6-8
    for i in range(OUT_BINARY):
        cols[OUT_UNARY + 2 * i] = BIN_LEFT + i                  # left  -> lanes 16..25
        cols[OUT_UNARY + 2 * i + 1] = BIN_LEFT + BIN_SHIFT + i  # right -> lanes 80..89
    return cols


def _h_row_map():
    """logical EQL-layer-output feature -> padded lane (single 128-lane block)."""
    rows = np.zeros(HIDDEN_FEATS, dtype=np.int32)
    rows[:OUT_UNARY] = np.arange(OUT_UNARY)                     # unary keep lanes 0-8
    rows[OUT_UNARY:] = BIN_LEFT + np.arange(OUT_BINARY)         # products at lanes 16-25
    return rows


def pad_params(params, input_dim, output_dim, use_division, weight_dtype=None):
    if weight_dtype is None:
        weight_dtype = _default_weight_dtype()
    z_cols = _z_col_map()
    h_rows = _h_row_map()
    cos_cols = z_cols[2 * GROUP:3 * GROUP]
    padded = []
    for li, (W, b) in enumerate(params["hidden"]):
        rows = np.arange(input_dim, dtype=np.int32) if li == 0 else h_rows
        n_rows = input_dim if li == 0 else LANE
        Wp = jnp.zeros((n_rows, LANE), jnp.float32)
        Wp = Wp.at[rows[:, None], z_cols[None, :]].set(W)
        bp = jnp.zeros((1, LANE), jnp.float32).at[0, z_cols].set(b)
        # Fold cos into sin: +pi/2 ONLY on the cos columns' bias; padded lanes
        # keep bias 0 so sin(0) = 0 stays 0 there.
        bp = bp.at[0, cos_cols].add(np.float32(np.pi / 2))
        padded.extend([Wp.astype(weight_dtype), bp])            # biases stay f32

    if use_division:
        o_cols = np.concatenate([np.arange(output_dim),
                                 LANE + np.arange(output_dim)]).astype(np.int32)
        n_out_cols = 2 * LANE
    else:
        o_cols = np.arange(output_dim, dtype=np.int32)
        n_out_cols = LANE
    Wo = jnp.zeros((LANE, n_out_cols), jnp.float32)
    Wo = Wo.at[h_rows[:, None], o_cols[None, :]].set(params["Wout"])
    bo = jnp.zeros((1, n_out_cols), jnp.float32).at[0, o_cols].set(params["bout"])
    padded.extend([Wo.astype(weight_dtype), bo])
    return padded


# ----------------------------------------------------------------------------
# Forward wrapper around pallas_call
# ----------------------------------------------------------------------------
def deep_eql_forward(x, padded_params, *, num_hidden, output_dim,
                     use_division=False, division_threshold=0.1, batch_block=512):
    B, input_dim = x.shape

    # Batch tiling: large tiles (default 512) amortize the ~0.35us/step pipeline
    # overhead; always leave >= 2 grid steps when the batch allows it so the
    # "parallel" batch axis can shard across both TensorCores on v7x.
    B8 = _round_up(max(B, 8), 8)
    bb = min(_round_up(batch_block, 8), B8)
    n_steps = max(_cdiv(B8, bb), 2 if B8 >= 16 else 1)
    bb = _round_up(_cdiv(B8, n_steps), 8)
    B_pad = _round_up(B8, bb)
    if B_pad != B:
        x = jnp.pad(x, ((0, B_pad - B), (0, 0)))

    # x streamed at its true width (full last dim). Weights/biases use a
    # constant index_map -> DMA'd once and kept VMEM-resident across the grid.
    # (pipeline_mode=pl.Buffered(1) on the constant specs would trim ~100 KB of
    #  redundant second buffers; skipped — negligible with this packing.)
    in_specs = [pl.BlockSpec((bb, input_dim), lambda i: (i, 0))]
    for p in padded_params:
        in_specs.append(pl.BlockSpec(p.shape, lambda i: (0, 0)))
    # Output stays lane-dense at 128 lanes (unmasked vector stores).
    out_spec = pl.BlockSpec((bb, LANE), lambda i: (i, 0))

    kernel = functools.partial(_deep_eql_kernel,
                               num_hidden=num_hidden,
                               use_division=use_division,
                               division_threshold=division_threshold)

    out_padded = pl.pallas_call(
        kernel,
        out_shape=jax.ShapeDtypeStruct((B_pad, LANE), jnp.float32),
        grid_spec=pltpu.PrefetchScalarGridSpec(
            num_scalar_prefetch=0,
            grid=(B_pad // bb,),
            in_specs=in_specs,
            out_specs=out_spec,
        ),
        compiler_params=pltpu.CompilerParams(
            dimension_semantics=("parallel",)),
    )(x, *padded_params)

    # Final narrow slice left to XLA / the consumer (a <128-lane out_spec would
    # force masked partial stores inside the kernel).
    return out_padded[:B, :output_dim]


# ----------------------------------------------------------------------------
# Pure-JAX reference (mirrors the PyTorch forward exactly)
# ----------------------------------------------------------------------------
def reference_forward(x, params, use_division, division_threshold):
    h = x
    gs = OUT_UNARY // 3
    for (W, b) in params["hidden"]:
        z = h @ W + b
        unary = jnp.concatenate(
            [z[:, :gs], jnp.sin(z[:, gs:2 * gs]), jnp.cos(z[:, 2 * gs:3 * gs])], axis=1)
        binary = jnp.prod(z[:, OUT_UNARY:].reshape(-1, OUT_BINARY, 2), axis=2)
        h = jnp.concatenate([unary, binary], axis=1)
    out = h @ params["Wout"] + params["bout"]
    if use_division:
        half = out.shape[1] // 2
        num, den = out[:, :half], out[:, half:]
        out = jnp.where(jnp.abs(den) > division_threshold, num / den,
                        jnp.zeros_like(num))
    return out


# ----------------------------------------------------------------------------
if __name__ == "__main__":
    key = jax.random.PRNGKey(0)
    input_dim, hidden_layers, output_dim = 4, 2, 3
    division_threshold = 0.1
    B = 16

    k_x, k_p0, k_p1 = jax.random.split(key, 3)
    x = jax.random.normal(k_x, (B, input_dim), jnp.float32)

    # (use_division, param key, weight dtype, tolerance)
    cases = [
        (False, k_p0, jnp.float32, 1e-4),   # f32 path, tight
        (True,  k_p1, jnp.float32, 5e-4),   # division: approx recip + Newton
        (False, k_p0, jnp.bfloat16, 1e-1),  # bf16 MXU operands vs f32 reference
    ]
    for use_division, k_p, wdt, tol in cases:
        params = init_params(k_p, input_dim, hidden_layers, output_dim, use_division)
        padded = pad_params(params, input_dim, output_dim, use_division,
                            weight_dtype=wdt)

        y = deep_eql_forward(x, padded,
                             num_hidden=hidden_layers,
                             output_dim=output_dim,
                             use_division=use_division,
                             division_threshold=division_threshold,
                             batch_block=512)
        jax.block_until_ready(y)

        y_ref = reference_forward(x, params, use_division, division_threshold)
        assert y.shape == (B, output_dim)
        assert jnp.allclose(y, y_ref, atol=tol, rtol=tol), \
            f"mismatch vs. reference (use_division={use_division}, dtype={wdt})"

    print("KERNEL_OK")
</pallas_src>

<mosaic_0001>
module attributes {stable_mosaic.version = 11 : i64} {
  func.func @_deep_eql_kernel(%arg0: i32, %arg1: memref<8x4xf32, #tpu.memory_space<vmem>>, %arg2: memref<4x128xf32, #tpu.memory_space<vmem>>, %arg3: memref<1x128xf32, #tpu.memory_space<vmem>>, %arg4: memref<128x128xf32, #tpu.memory_space<vmem>>, %arg5: memref<1x128xf32, #tpu.memory_space<vmem>>, %arg6: memref<128x128xf32, #tpu.memory_space<vmem>>, %arg7: memref<1x128xf32, #tpu.memory_space<vmem>>, %arg8: memref<8x128xf32, #tpu.memory_space<vmem>>) attributes {dimension_semantics = [#tpu.dimension_semantics<parallel>], iteration_bounds = array<i64: 2>, scalar_prefetch = 0 : i64, scratch_operands = 0 : i64, tpu.core_type = #tpu.core_type<tc>, window_params = [{transform_indices = @transform_0, window_bounds = array<i64: 8, 4>}, {pipeline_mode = #tpu.pipeline_mode<synchronous>, transform_indices = @transform_1, window_bounds = array<i64: 4, 128>}, {pipeline_mode = #tpu.pipeline_mode<synchronous>, transform_indices = @transform_2, window_bounds = array<i64: 1, 128>}, {pipeline_mode = #tpu.pipeline_mode<synchronous>, transform_indices = @transform_3, window_bounds = array<i64: 128, 128>}, {pipeline_mode = #tpu.pipeline_mode<synchronous>, transform_indices = @transform_4, window_bounds = array<i64: 1, 128>}, {pipeline_mode = #tpu.pipeline_mode<synchronous>, transform_indices = @transform_5, window_bounds = array<i64: 128, 128>}, {pipeline_mode = #tpu.pipeline_mode<synchronous>, transform_indices = @transform_6, window_bounds = array<i64: 1, 128>}, {transform_indices = @transform_7, window_bounds = array<i64: 8, 128>}]} {
    %0 = tpu.iota {dimensions = array<i32: 1>} : vector<8x128xi32>
    %c3_i32 = arith.constant 3 : i32
    %1 = vector.broadcast %c3_i32 : i32 to vector<8x128xi32>
    %2 = arith.cmpi slt, %0, %1 : vector<8x128xi32>
    %c9_i32 = arith.constant 9 : i32
    %3 = vector.broadcast %c9_i32 : i32 to vector<8x128xi32>
    %4 = arith.cmpi slt, %0, %3 : vector<8x128xi32>
    %c0 = arith.constant 0 : index
    %c0_0 = arith.constant 0 : index
    %5 = vector.load %arg1[%c0, %c0_0] : memref<8x4xf32, #tpu.memory_space<vmem>>, vector<8x4xf32>
    %c0_1 = arith.constant 0 : index
    %c0_2 = arith.constant 0 : index
    %6 = vector.load %arg2[%c0_1, %c0_2] : memref<4x128xf32, #tpu.memory_space<vmem>>, vector<4x128xf32>
    %cst = arith.constant dense<0.000000e+00> : vector<8x128xf32>
    %7 = tpu.matmul %5, %6, %cst {dimension_numbers = #tpu.dot_dimension_numbers<[1], [0], [0], [1], [0, 0, 1, 1], [], []>} : vector<8x4xf32>, vector<4x128xf32>, vector<8x128xf32> -> vector<8x128xf32>
    %c0_3 = arith.constant 0 : index
    %c0_4 = arith.constant 0 : index
    %8 = vector.load %arg3[%c0_3, %c0_4] : memref<1x128xf32, #tpu.memory_space<vmem>>, vector<1x128xf32>
    %9 = vector.broadcast %8 : vector<1x128xf32> to vector<8x128xf32>
    %10 = arith.addf %7, %9 : vector<8x128xf32>
    %11 = math.sin %10 : vector<8x128xf32>
    %c64_i32 = arith.constant 64 : i32
    %12 = tpu.dynamic_rotate %10 by %c64_i32 dim 1 : vector<8x128xf32>, i32 -> vector<8x128xf32>
    %13 = arith.mulf %10, %12 : vector<8x128xf32>
    %14 = arith.select %4, %11, %13 : vector<8x128xi1>, vector<8x128xf32>
    %15 = arith.select %2, %10, %14 : vector<8x128xi1>, vector<8x128xf32>
    %c0_5 = arith.constant 0 : index
    %c0_6 = arith.constant 0 : index
    %16 = vector.load %arg4[%c0_5, %c0_6] : memref<128x128xf32, #tpu.memory_space<vmem>>, vector<128x128xf32>
    %cst_7 = arith.constant dense<0.000000e+00> : vector<8x128xf32>
    %17 = tpu.matmul %15, %16, %cst_7 {dimension_numbers = #tpu.dot_dimension_numbers<[1], [0], [0], [1], [0, 0, 1, 1], [], []>} : vector<8x128xf32>, vector<128x128xf32>, vector<8x128xf32> -> vector<8x128xf32>
    %c0_8 = arith.constant 0 : index
    %c0_9 = arith.constant 0 : index
    %18 = vector.load %arg5[%c0_8, %c0_9] : memref<1x128xf32, #tpu.memory_space<vmem>>, vector<1x128xf32>
    %19 = vector.broadcast %18 : vector<1x128xf32> to vector<8x128xf32>
    %20 = arith.addf %17, %19 : vector<8x128xf32>
    %21 = math.sin %20 : vector<8x128xf32>
    %c64_i32_10 = arith.constant 64 : i32
    %22 = tpu.dynamic_rotate %20 by %c64_i32_10 dim 1 : vector<8x128xf32>, i32 -> vector<8x128xf32>
    %23 = arith.mulf %20, %22 : vector<8x128xf32>
    %24 = arith.select %4, %21, %23 : vector<8x128xi1>, vector<8x128xf32>
    %25 = arith.select %2, %20, %24 : vector<8x128xi1>, vector<8x128xf32>
    %c0_11 = arith.constant 0 : index
    %c0_12 = arith.constant 0 : index
    %26 = vector.load %arg6[%c0_11, %c0_12] : memref<128x128xf32, #tpu.memory_space<vmem>>, vector<128x128xf32>
    %cst_13 = arith.constant dense<0.000000e+00> : vector<8x128xf32>
    %27 = tpu.matmul %25, %26, %cst_13 {dimension_numbers = #tpu.dot_dimension_numbers<[1], [0], [0], [1], [0, 0, 1, 1], [], []>} : vector<8x128xf32>, vector<128x128xf32>, vector<8x128xf32> -> vector<8x128xf32>
    %c0_14 = arith.constant 0 : index
    %c0_15 = arith.constant 0 : index
    %28 = vector.load %arg7[%c0_14, %c0_15] : memref<1x128xf32, #tpu.memory_space<vmem>>, vector<1x128xf32>
    %29 = vector.broadcast %28 : vector<1x128xf32> to vector<8x128xf32>
    %30 = arith.addf %27, %29 : vector<8x128xf32>
    %c0_16 = arith.constant 0 : index
    %c0_17 = arith.constant 0 : index
    %31 = vector.load %arg8[%c0_16, %c0_17] : memref<8x128xf32, #tpu.memory_space<vmem>>, vector<8x128xf32>
    tpu.vector_store %arg8[%c0_16, %c0_17], %30 {strides = array<i32>} : memref<8x128xf32, #tpu.memory_space<vmem>>, vector<8x128xf32>,
    return
  }
  func.func @transform_0(%arg0: i32) -> (i32, i32) {
    %c0_i32 = arith.constant 0 : i32
    %c0_i32_0 = arith.constant 0 : i32
    return %arg0, %c0_i32 : i32, i32
  }
  func.func @transform_1(%arg0: i32) -> (i32, i32) {
    %c0_i32 = arith.constant 0 : i32
    %c0_i32_0 = arith.constant 0 : i32
    %c0_i32_1 = arith.constant 0 : i32
    return %c0_i32, %c0_i32_0 : i32, i32
  }
  func.func @transform_2(%arg0: i32) -> (i32, i32) {
    %c0_i32 = arith.constant 0 : i32
    %c0_i32_0 = arith.constant 0 : i32
    %c0_i32_1 = arith.constant 0 : i32
    return %c0_i32, %c0_i32_0 : i32, i32
  }
  func.func @transform_3(%arg0: i32) -> (i32, i32) {
    %c0_i32 = arith.constant 0 : i32
    %c0_i32_0 = arith.constant 0 : i32
    %c0_i32_1 = arith.constant 0 : i32
    return %c0_i32, %c0_i32_0 : i32, i32
  }
  func.func @transform_4(%arg0: i32) -> (i32, i32) {
    %c0_i32 = arith.constant 0 : i32
    %c0_i32_0 = arith.constant 0 : i32
    %c0_i32_1 = arith.constant 0 : i32
    return %c0_i32, %c0_i32_0 : i32, i32
  }
  func.func @transform_5(%arg0: i32) -> (i32, i32) {
    %c0_i32 = arith.constant 0 : i32
    %c0_i32_0 = arith.constant 0 : i32
    %c0_i32_1 = arith.constant 0 : i32
    return %c0_i32, %c0_i32_0 : i32, i32
  }
  func.func @transform_6(%arg0: i32) -> (i32, i32) {
    %c0_i32 = arith.constant 0 : i32
    %c0_i32_0 = arith.constant 0 : i32
    %c0_i32_1 = arith.constant 0 : i32
    return %c0_i32, %c0_i32_0 : i32, i32
  }
  func.func @transform_7(%arg0: i32) -> (i32, i32) {
    %c0_i32 = arith.constant 0 : i32
    %c0_i32_0 = arith.constant 0 : i32
    return %arg0, %c0_i32 : i32, i32
  }
}

</mosaic_0001>

<bundles_post_ra>
// kernel: tpu_custom_call.1
= control target key start
LH: loop header
LB: loop body
LE: loop exit
PB: predicated region body
PF: predicated region fallthrough
CT: control target
= control target key end

     0   :  { %12 = vsyncpa [#allocation3], 0  ;;  %s1562_s0 = inlined_call_operand.vmem [shape: f32[16,4], index: 0, kind: input, shape index: {}]   ;;  %s1563_s1 = inlined_call_operand.vmem [shape: f32[4,128], index: 1, kind: input, shape index: {}]   ;;  %s1564_s2 = inlined_call_operand.vmem [shape: f32[1,128], index: 2, kind: input, shape index: {}]   ;;  %s1565_s3 = inlined_call_operand.hbm [shape: f32[128,128], index: 3, kind: input, shape index: {}]   ;;  %s1566_s4 = inlined_call_operand.vmem [shape: f32[1,128], index: 4, kind: input, shape index: {}]   ;;  %s1567_s5 = inlined_call_operand.hbm [shape: f32[128,128], index: 5, kind: input, shape index: {}]   ;;  %s1568_s6 = inlined_call_operand.vmem [shape: f32[1,128], index: 6, kind: input, shape index: {}]   ;;  %s1569_s7 = inlined_call_operand.hbm [shape: f32[16,128], index: 7, kind: output, shape index: {}]  }
   0x1   :  { %13 = vsyncpa [#allocation6], 0 }
   0x2   :  { %14 = vsyncpa [#allocation4], 0 }
   0x3   :  { %16 = vsyncpa [#allocation4 + $0x1], 0  ;;  %s1296_s24 = smov 0   ;;  %s1298_s25 = smov 0  }
   0x4   :  { %s1300_s26 = smov 0   ;;  %s1302_s27 = smov 0  }
   0x5 LB: > { %s1317_s28 = sadd.s32 4294967295, %s1240_s27   ;;  %s895_s29 = sadd.s32 4294967294, %s1240_s27   ;;  %s1240_s27 = sphi %s1302_s27, %s1583_s27   ;;  %s1236_s26 = sphi %s1300_s26, %s1582_s26   ;;  %s1232_s25 = sphi %s1298_s25, %s1581_s25   ;;  %s1228_s24 = sphi %s1296_s24, %s1580_s24  }
   0x6   : > { %s1321_s30 = sadd.s32 1, %s1240_s27   ;;  %s181_s8 = sadd.s32 1, %s1236_s26 }
   0x7   : > { %s178_s9 = ssub.s32 %s1240_s27, %s1321_s30  ;;  %p191_p0 = scmp.ne.s32.totalorder %s1236_s26, %s1232_s25 }
   0x8   : > { %p179_p1 = scmp.eq.s32.totalorder %s178_s9, 0  ;;  %p192_p2 = scmp.eq.s32.totalorder %s1317_s28, 1 }
   0x9   : > { %p197_p3 = scmp.ne.s32.totalorder %s1232_s25, %s1228_s24  ;;  %p198_p4 = scmp.eq.s32.totalorder %s895_s29, 1 }
   0xa   : > { %s1332_s10 = scalar_select %p179_p1, %s1236_s26, %s181_s8  }
   0xb   : > { %p1334_p5 = por %p192_p2, %p191_p0  ;;  %p1338_p6 = por %p198_p4, %p197_p3 }
   0xc   : > { %p896_p7 = scmp.ge.s32.totalorder %s1240_s27, 1  ;;  %p205_p8 = scmp.lt.s32.totalorder %s1240_s27, 3 }
   0xd   : > { %s1572_s12 = scalar_select %p1338_p6, 1, 0 }
   0xe   : > { %p1570_p9 = scmp.eq.s32.totalorder %s1317_s28, 0  ;;  %p1345_p10 = pnand %p896_p7, %p205_p8 }
   0xf   : > { %s1242_s14 = smov [#allocation2]   ;;  %s1243_s17 = smov [#allocation5]  }
  0x10   : > { %s223_s15 = sshll.u32 %s1242_s14, 4  ;;  %p1051_p11 = pneg %p1345_p10  ;;  %s224_s15 = int_to_ptr.vmem [resolvable:$true] %s223_s15 }
  0x11   : > { %s239_s18 = sshll.u32 %s1243_s17, 4  ;;  %s1131_s19 = scalar_lea.vmem %s224_s15, 2048  ;;  %s240_s18 = int_to_ptr.vmem [resolvable:$true] %s239_s18 }
  0x12   : > { %p1353_p12 = pnand %p1570_p9, %p1051_p11  ;;  %p1132_p0 = scmp.ne.s32.totalorder %s224_s15, %s1131_s19 }
  0x13   : > { %p1139_p3 = scmp.lt.s32.totalorder %s224_s15, %s224_s15  ;;  %p1140_p4 = scmp.lt.s32.totalorder %s1131_s19, %s1131_s19 }
  0x14   : > { %p1122_p13 = pneg %p1353_p12 }
  0x15   : > { %p1141_p7 = por %p1140_p4, %p1139_p3 }
  0x16   : > { %p1134_p1 = pnand %p1132_p0, %p1122_p13 }
  0x18   : > { %p1135_p2 = pneg %p1134_p1 }
  0x1a   : > { %p1142_p8 = pnand %p1141_p7, %p1135_p2 }
  0x1c   : > { %1145 = shalt.err (!%p1142_p8)
}
  0x1d   : > { %s1244_s20 = smov 128   ;;  %s1245_s21 = smov 8  }
  0x1e   : > { %1054 = dma.hbm_to_vmem [thread:$0]  (!%p1353_p12), %s1565_s3, 2048, %s224_s15, [#allocation3], %s1244_s20, %s1244_s20, %s1245_s21  }
  0x1f   : > { %s1157_s29 = scalar_lea.vmem %s240_s18, 2048  ;;  %p1165_p9 = scmp.lt.s32.totalorder %s240_s18, %s240_s18 }
  0x20   : > { %p1158_p11 = scmp.ne.s32.totalorder %s240_s18, %s1157_s29  ;;  %p1166_p6 = scmp.lt.s32.totalorder %s1157_s29, %s1157_s29 }
  0x22   : > { %p1160_p0 = pnand %p1158_p11, %p1122_p13  ;;  %p1167_p3 = por %p1166_p6, %p1165_p9 }
  0x24   : > { %p1161_p1 = pneg %p1160_p0 }
  0x26   : > { %p1168_p2 = pnand %p1167_p3, %p1161_p1 }
  0x28   : > { %1171 = shalt.err (!%p1168_p2)
}
  0x29   : > { %1057 = dma.hbm_to_vmem [thread:$0]  (!%p1353_p12), %s1567_s5, 2048, %s240_s18, [#allocation6], %s1244_s20, %s1244_s20, %s1245_s21  }
  0x2a   : > { %265 = sbr.rel (%p1345_p10) target bundleno = 894 (0x37e), region = 48  ;;  %p1575_p4 = scmp.eq.s32.totalorder (!%p1345_p10), %s1317_s28, 0 }
  0x2f   : > { %1215 = dma.done.wait (%p1575_p4), [#allocation3], 2048   ;;  %p1576_p13 = pmov %p1575_p4 }
  0x30   : > { %p1577_p7 = pmov %p1575_p4 }
  0x31   : > { %1217 = vsyncadd (%p1576_p13), [#allocation3], 4294965248 }
  0x32   : > { %1219 = dma.done.wait (%p1577_p7), [#allocation6], 2048   ;;  %p1578_p6 = pmov %p1575_p4 }
  0x33   : > { %p300_p9 = scmp.lt.s32.totalorder %s1317_s28, 1  ;;  %v1246_v0 = vmov 0.0   ;;  %vm1247_vm0 = vmmov 0   ;;  %vm321_vm1 = vcmask 1043456   ;;  %vm317_vm2 = vcmask 31744   ;;  %v519_v3 = vld [vmem:[#allocation2 + $0x78] sm:$0xff] }
  0x34   : > { %1221 = vsyncadd (%p1578_p6), [#allocation6], 4294965248  ;;  %958 = vmatprep.subr.mxu0 %v1246_v0  ;;  %960 = vmatprep.mubr.msk.f32.mxu0 %vm1247_vm0, %v1246_v0  ;;  %v309_v1 = vld [vmem:[%s1563_s1] sm:$0xf]  ;;  %v518_v4 = vld [vmem:[#allocation2 + $0x70] sm:$0xff]  ;;  %s1248_s22 = smov 64  }
  0x35   : > { %s301_s13 = scalar_select %p300_p9, %s1317_s28, 1  ;;  %963 = vmatprep.subr.mxu1 %v1246_v0  ;;  %995 = vmatprep.mubr.msk.f32.mxu1 %vm1247_vm0, %v1246_v0  ;;  %v517_v5 = vld [vmem:[#allocation2 + $0x68] sm:$0xff]  ;;  %v516_v6 = vld [vmem:[#allocation2 + $0x60] sm:$0xff]  ;;  %v515_v7 = vld [vmem:[#allocation2 + $0x58] sm:$0xff]  ;;  %v1249_v33 = vmov 683565275  }
  0x36   : > { %959 = vmatpush3.msk.msra.mxu0 %vm321_vm1, %v309_v1  ;;  %964 = vmatpush3.msra.mxu1 %v519_v3  ;;  %v514_v8 = vld [vmem:[#allocation2 + $0x50] sm:$0xff]  ;;  %v513_v9 = vld [vmem:[#allocation2 + $0x48] sm:$0xff]  ;;  %v512_v10 = vld [vmem:[#allocation2 + $0x40] sm:$0xff]  ;;  %v1250_v35 = vmov 2475754826   ;;  %s297_s8 = sand.u32 1, %s1232_s25  }
  0x37   : > { %s904_s14 = sshll.u32 %s301_s13, 3  ;;  %998 = vmatprep.subr.mxu0 %v1246_v0  ;;  %965 = vmatprep.subr.mxu1 %v1246_v0  ;;  %v511_v11 = vld [vmem:[#allocation2 + $0x38] sm:$0xff]  ;;  %v510_v12 = vld [vmem:[#allocation2 + $0x30] sm:$0xff]  ;;  %v509_v13 = vld [vmem:[#allocation2 + $0x28] sm:$0xff]  ;;  %v1251_v38 = vmov 2131351028  }
  0x38   : > { %s303_s17 = scalar_lea.vmem %s1562_s0, %s904_s14  ;;  %966 = vmatpush3.msra.mxu1 %v518_v4  ;;  %v508_v14 = vld [vmem:[#allocation2 + $0x20] sm:$0xff]  ;;  %v507_v15 = vld [vmem:[#allocation2 + $0x18] sm:$0xff]  ;;  %v506_v16 = vld [vmem:[#allocation2 + $0x10] sm:$0xff]  ;;  %v1252_v41 = vmov 2102212464   ;;  %s903_s9 = sshll.u32 %s297_s8, 3 }
  0x39   : > { %v308_v2 = vld [vmem:[%s303_s17] sm:$0xff]  ;;  %967 = vmatprep.subr.mxu1 %v1246_v0  ;;  %v505_v17 = vld [vmem:[#allocation2 + $0x8] sm:$0xff]  ;;  %v1253_v44 = vmov 920167782   ;;  %v1254_v47 = vmov 1326507024  }
  0x3a   : > { %961 = vmatmul.mubr.msk.f32.vlgmr.msra.gmra.mxu0 %vm317_vm2, %v308_v2  ;;  %968 = vmatpush3.msra.mxu1 %v517_v5  ;;  %v504_v18 = vld [vmem:[#allocation2] sm:$0xff]  ;;  %s919_s15 = sshll.u32 %s1317_s28, 7  ;;  %s299_s16 = scalar_lea.vmem [#allocation7], %s903_s9 }
  0x3b   : > { %1030 = vmatprep.mubr.msk.f32.mxu0 %vm1247_vm0, %v1246_v0  ;;  %969 = vmatprep.subr.mxu1 %v1246_v0  ;;  %v905_v19 = vld [vmem:[%s1564_s2] ss:$0 sm:$0xff]  ;;  %s814_s17 = sshll.u32 %s299_s16, 4  ;;  %s1527_s20 = scalar_lea.hbm %s1569_s7, %s919_s15  ;;  %s815_s17 = int_to_ptr.vmem [resolvable:$true] %s814_s17 }
  0x3c   : > { %970 = vmatpush3.msra.mxu1 %v516_v6  ;;  %s801_s21 = scalar_lea.sflag [#allocation4], %s297_s8  ;;  %s1255_s23 = smov [#allocation7]  }
  0x3d   : > { %971 = vmatprep.subr.mxu1 %v1246_v0  ;;  %s1176_s28 = sshll.u32 %s1255_s23, 4  ;;  %s1177_s28 = int_to_ptr.vmem [resolvable:$false] %s1176_s28 }
  0x3e   : > { %972 = vmatpush3.msra.mxu1 %v515_v7  ;;  %s1178_s29 = scalar_lea.vmem %s1177_s28, 256  ;;  %p1179_p11 = scmp.lt.s32.totalorder %s815_s17, %s1177_s28 }
  0x3f   : > { %973 = vmatprep.subr.mxu1 %v1246_v0 }
  0x40   : > { %974 = vmatpush3.msra.mxu1 %v514_v8 }
  0x41   : > { %975 = vmatprep.subr.mxu1 %v1246_v0 }
  0x42   : > { %976 = vmatpush3.msra.mxu1 %v513_v9 }
  0x43   : > { %977 = vmatprep.subr.mxu1 %v1246_v0 }
  0x44   : > { %978 = vmatpush3.msra.mxu1 %v512_v10 }
  0x45   : > { %979 = vmatprep.subr.mxu1 %v1246_v0 }
  0x46   : > { %980 = vmatpush3.msra.mxu1 %v511_v11 }
  0x47   : > { %981 = vmatprep.subr.mxu1 %v1246_v0 }
  0x48   : > { %982 = vmatpush3.msra.mxu1 %v510_v12 }
  0x49   : > { %983 = vmatprep.subr.mxu1 %v1246_v0 }
  0x4a   : > { %984 = vmatpush3.msra.mxu1 %v509_v13 }
  0x4b   : > { %985 = vmatprep.subr.mxu1 %v1246_v0 }
  0x4c   : > { %986 = vmatpush3.msra.mxu1 %v508_v14 }
  0x4d   : > { %987 = vmatprep.subr.mxu1 %v1246_v0 }
  0x4e   : > { %988 = vmatpush3.msra.mxu1 %v507_v15 }
  0x4f   : > { %989 = vmatprep.subr.mxu1 %v1246_v0 }
  0x50   : > { %990 = vmatpush3.msra.mxu1 %v506_v16 }
  0x51   : > { %991 = vmatprep.subr.mxu1 %v1246_v0 }
  0x52   : > { %992 = vmatpush3.msra.mxu1 %v505_v17 }
  0x53   : > { %993 = vmatprep.subr.mxu1 %v1246_v0 }
  0x54   : > { %994 = vmatpush3.msra.mxu1 %v504_v18 }
  0xfa   : > { %v391_v20 = vpop.f32.mrf.mxu0 }
  0xfb   : > { %v1417_v21 = vadd.f32 %v905_v19, %v391_v20 }
  0xfc   : > { %v962_v22 = vpop.f32.mrf.mxu0 }
  0xfd   : > { %v398_v23 = vand.u32 2139095040, %v1417_v21  ;;  %499 = vrot.lane.b32.xlu0 %v1417_v21, %s1248_s22  ;;  %v395_v27 = vand.u32 2147483647, %v1417_v21  ;;  %vm397_vm10 = vcmp.lt.s32.totalorder %v1417_v21, 0  ;;  %vm487_vm1 = vweird.f32 %v1417_v21 }
  0xff   : > { %v399_v24 = vshrl.u32 %v398_v23, 23  ;;  %v402_v30 = vand.u32 8388607, %v395_v27  ;;  %vm396_vm11 = vcmp.le.f32.partialorder %v395_v27, 0.7853982 }
 0x101   : > { %v908_v25 = vadd.s32 4294967169, %v399_v24  ;;  %v403_v49 = vor.u32 8388608, %v402_v30 }
 0x103   : > { %v405_v26 = vadd.s32 1, %v908_v25  ;;  %v443_v63 = vshll.u32 %v403_v49, 8 }
 0x105   : > { %vm406_vm3 = vcmp.gt.s32.totalorder %v405_v26, 0 }
 0x106   : > { %v407_v28 = vsel %vm406_vm3, %v405_v26, 0 }
 0x107   : > { %v409_v29 = vand.u32 31, %v407_v28  ;;  %v408_v32 = vshrl.u32 %v407_v28, 5 }
 0x109   : > { %v410_v31 = vsub.s32 32, %v409_v29  ;;  %v412_v34 = vshll.u32 %v1249_v33, %v409_v29  ;;  %v415_v36 = vshll.u32 %v1250_v35, %v409_v29  ;;  %v418_v40 = vshll.u32 %v1251_v38, %v409_v29 }
 0x10a   : > { %v421_v43 = vshll.u32 %v1252_v41, %v409_v29  ;;  %v424_v46 = vshll.u32 %v1253_v44, %v409_v29  ;;  %vm427_vm4 = vcmp.lt.s32.totalorder %v408_v32, 1  ;;  %vm430_vm5 = vcmp.lt.s32.totalorder %v408_v32, 4 }
 0x10b   : > { %v413_v37 = vshrl.u32 %v1250_v35, %v410_v31  ;;  %v416_v39 = vshrl.u32 %v1251_v38, %v410_v31  ;;  %v419_v42 = vshrl.u32 %v1252_v41, %v410_v31  ;;  %v422_v45 = vshrl.u32 %v1253_v44, %v410_v31 }
 0x10c   : > { %v425_v48 = vshrl.u32 %v1254_v47, %v410_v31  ;;  %v411_v58 = vshrl.u32 %v1249_v33, %v410_v31  ;;  %vm429_vm6 = vcmp.lt.s32.totalorder %v408_v32, 3  ;;  %vm428_vm7 = vcmp.lt.s32.totalorder %v408_v32, 2 }
 0x10d   : > { %v414_v50 = vor.u32 %v413_v37, %v412_v34  ;;  %v417_v51 = vor.u32 %v416_v39, %v415_v36  ;;  %v420_v52 = vor.u32 %v419_v42, %v418_v40  ;;  %v423_v53 = vor.u32 %v422_v45, %v421_v43 }
 0x10e   : > { %v426_v54 = vor.u32 %v425_v48, %v424_v46 }
 0x10f   : > { %v432_v55 = vsel %vm430_vm5, %v420_v52, 2102212464  ;;  %v435_v56 = vsel %vm427_vm4, %v414_v50, %v417_v51  ;;  %v439_v57 = vsel %vm427_vm4, %v417_v51, %v420_v52  ;;  %v436_v59 = vsel %vm430_vm5, %v423_v53, 920167782 }
 0x110   : > { %v440_v60 = vsel %vm430_vm5, %v426_v54, 1326507024  ;;  %v437_v61 = vsel %vm429_vm6, %v420_v52, %v436_v59  ;;  %v431_v1 = vsel %vm427_vm4, %v411_v58, %v414_v50  ;;  %v433_v2 = vsel %vm429_vm6, %v417_v51, %v432_v55 }
 0x111   : > { %v441_v62 = vsel %vm429_vm6, %v423_v53, %v440_v60  ;;  %v438_v3 = vsel %vm428_vm7, %v435_v56, %v437_v61  ;;  %v434_v9 = vsel %vm428_vm7, %v431_v1, %v433_v2  ;;  %v304_v53 = vlaneseq  ;;  %v721_v1 = vld [vmem:[#allocation5 + $0x78] sm:$0xff]  ;;  %v720_v2 = vld [vmem:[#allocation5 + $0x70] sm:$0xff] }
 0x112   : > { %v442_v4 = vsel %vm428_vm7, %v439_v57, %v441_v62  ;;  %v1439_v7 = vmul.u32.u64.low %v443_v63, %v438_v3  ;;  %v1440_v8 = vmul.u32.u64.high %v443_v63, %v438_v3, %v1439_v7  ;;  %v450_v11 = vmul.u32 %v443_v63, %v434_v9  ;;  %999 = vmatpush3.msra.mxu0 %v721_v1  ;;  %v719_v3 = vld [vmem:[#allocation5 + $0x68] sm:$0xff]  ;;  %v712_v9 = vld [vmem:[#allocation5 + $0x30] sm:$0xff] }
 0x113   : > { %v1436_v5 = vmul.u32.u64.low %v443_v63, %v442_v4  ;;  %v1437_v6 = vmul.u32.u64.high %v443_v63, %v442_v4, %v1436_v5  ;;  %v1450_v56 = vand.u32 127, %v304_v53  ;;  %1000 = vmatprep.subr.mxu0 %v1246_v0  ;;  %v718_v4 = vld [vmem:[#allocation5 + $0x60] sm:$0xff] }
 0x114   : > { %v453_v10 = vadd.s32 1, %v1440_v8  ;;  %1001 = vmatpush3.msra.mxu0 %v720_v2  ;;  %v717_v5 = vld [vmem:[#allocation5 + $0x58] sm:$0xff] }
 0x115   : > { %vm452_vm8 = vc.u32 %v1437_v6, %v1439_v7  ;;  %v451_v28 = vadd.s32 %v1439_v7, %v1437_v6  ;;  %vm307_vm15 = vcmp.lt.s32.totalorder %v1450_v56, 9  ;;  %vm306_vm0 = vcmp.lt.s32.totalorder %v1450_v56, 3  ;;  %1002 = vmatprep.subr.mxu0 %v1246_v0  ;;  %v716_v6 = vld [vmem:[#allocation5 + $0x50] sm:$0xff]  ;;  %v714_v7 = vld [vmem:[#allocation5 + $0x40] sm:$0xff] }
 0x116   : > { %v454_v12 = vsel %vm452_vm8, %v453_v10, %v1440_v8  ;;  %1003 = vmatpush3.msra.mxu0 %v719_v3  ;;  %v713_v8 = vld [vmem:[#allocation5 + $0x38] sm:$0xff]  ;;  %v711_v10 = vld [vmem:[#allocation5 + $0x28] sm:$0xff] }
 0x117   : > { %v455_v13 = vadd.s32 %v454_v12, %v450_v11  ;;  %1004 = vmatprep.subr.mxu0 %v1246_v0  ;;  %v710_v11 = vld [vmem:[#allocation5 + $0x20] sm:$0xff]  ;;  %v709_v12 = vld [vmem:[#allocation5 + $0x18] sm:$0xff] }
 0x118   : > { %1005 = vmatpush3.msra.mxu0 %v718_v4 }
 0x119   : > { %v456_v14 = vadd.s32 536870912, %v455_v13  ;;  %1006 = vmatprep.subr.mxu0 %v1246_v0 }
 0x11a   : > { %1007 = vmatpush3.msra.mxu0 %v717_v5 }
 0x11b   : > { %v457_v15 = vshrl.u32 %v456_v14, 30  ;;  %1008 = vmatprep.subr.mxu0 %v1246_v0  ;;  %v707_v14 = vld [vmem:[#allocation5 + $0x8] sm:$0xff] }
 0x11c   : > { %1009 = vmatpush3.msra.mxu0 %v716_v6 }
 0x11d   : > { %v458_v16 = vshll.u32 %v457_v15, 30  ;;  %v481_v45 = vsub.s32 4, %v457_v15  ;;  %1010 = vmatprep.subr.mxu0 %v1246_v0 }
 0x11f   : > { %v459_v17 = vsub.s32 %v455_v13, %v458_v16  ;;  %v482_v46 = vsel %vm397_vm10, %v481_v45, %v457_v15  ;;  %v708_v13 = vld [vmem:[#allocation5 + $0x10] sm:$0xff]  ;;  %v706_v15 = vld [vmem:[#allocation5] sm:$0xff] }
 0x120   : > { %v484_v48 = vsel %vm396_vm11, 0, %v482_v46  ;;  %v912_v16 = vld [vmem:[%s1566_s4] ss:$0 sm:$0xff] }
 0x121   : > { %v461_v18 = vsub.s32 0, %v459_v17  ;;  %v488_v49 = vadd.s32 3, %v484_v48 }
 0x123   : > { %v909_v19 = vmin.u32 %v461_v18, %v459_v17  ;;  %v489_v52 = vand.u32 3, %v488_v49 }
 0x125   : > { %v463_v20 = vclz %v909_v19  ;;  %vm491_vm12 = vcmp.eq.s32.totalorder %v489_v52, 0  ;;  %vm494_vm13 = vcmp.eq.s32.totalorder %v489_v52, 2  ;;  %vm490_vm14 = vcmp.lt.s32.totalorder %v489_v52, 2 }
 0x127   : > { %v910_v22 = vadd.s32 4294967294, %v463_v20 }
 0x129   : > { %vm911_vm9 = vcmp.lt.s32.totalorder %v910_v22, 0 }
 0x12a   : > { %v466_v23 = vsel %vm911_vm9, 0, %v910_v22 }
 0x12b   : > { %v471_v24 = vsub.s32 4294967266, %v466_v23  ;;  %v467_v26 = vsub.s32 32, %v466_v23  ;;  %v468_v31 = vshll.u32 %v459_v17, %v466_v23 }
 0x12d   : > { %v472_v25 = vadd.s32 127, %v471_v24  ;;  %v469_v30 = vshrl.u32 %v451_v28, %v467_v26 }
 0x12f   : > { %v473_v29 = vshll.u32 %v472_v25, 23  ;;  %v470_v34 = vor.u32 %v469_v30, %v468_v31 }
 0x131   : > { %v474_v32 = vor.u32 4788187, %v473_v29  ;;  %v477_v37 = vcvt.s32.f32 %v470_v34 }
 0x133   : > { %v475_v36 = vand.u32 2147483647, %v474_v32 }
 0x135   : > { %v478_v39 = vmul.f32 %v477_v37, %v475_v36 }
 0x137   : > { %v479_v40 = vxor.u32 2147483648, %v478_v39 }
 0x139   : > { %v480_v42 = vsel %vm397_vm10, %v479_v40, %v478_v39 }
 0x13a   : > { %v483_v43 = vsel %vm396_vm11, %v1417_v21, %v480_v42 }
 0x13b   : > { %1112 = vcosq.f32 %v483_v43 }
 0x13c   : > { %1114 = vsinq.f32 %v483_v43 }
 0x148   : > { %v1113_v50 = vpop.eup %1112 }
 0x149   : > { %v1115_v51 = vpop.eup %1114  ;;  %v495_v55 = vxor.u32 2147483648, %v1113_v50 }
 0x14a   : > { %v492_v54 = vxor.u32 2147483648, %v1115_v51 }
 0x14b   : > { %v496_v27 = vsel %vm494_vm13, %v495_v55, %v1115_v51 }
 0x14c   : > { %v493_v57 = vsel %vm491_vm12, %v1113_v50, %v492_v54 }
 0x14d   : > { %v497_v58 = vsel %vm490_vm14, %v493_v57, %v496_v27 }
 0x14e   : > { %v498_v61 = vsel %vm487_vm1, nan, %v497_v58 }
 0x16f   : > { %v500_v59 = vpop.permute.xlu0 %499 }
 0x170   : > { %v501_v60 = vmul.f32 %v500_v59, %v1417_v21 }
 0x172   : > { %v502_v62 = vsel %vm307_vm15, %v498_v61, %v501_v60 }
 0x173   : > { %v503_v63 = vsel %vm306_vm0, %v1417_v21, %v502_v62  ;;  %v715_v21 = vld [vmem:[#allocation5 + $0x48] sm:$0xff] }
 0x174   : > { %996 = vmatmul.mubr.f32.vlgmr.msra.gmra.mxu1 %v503_v63  ;;  %1011 = vmatpush3.msra.mxu0 %v715_v21 }
 0x175   : > { %1012 = vmatprep.subr.mxu0 %v1246_v0 }
 0x176   : > { %1013 = vmatpush3.msra.mxu0 %v714_v7 }
 0x177   : > { %1014 = vmatprep.subr.mxu0 %v1246_v0 }
 0x178   : > { %1015 = vmatpush3.msra.mxu0 %v713_v8 }
 0x179   : > { %1016 = vmatprep.subr.mxu0 %v1246_v0 }
 0x17a   : > { %1017 = vmatpush3.msra.mxu0 %v712_v9 }
 0x17b   : > { %1018 = vmatprep.subr.mxu0 %v1246_v0 }
 0x17c   : > { %1019 = vmatpush3.msra.mxu0 %v711_v10 }
 0x17d   : > { %1020 = vmatprep.subr.mxu0 %v1246_v0 }
 0x17e   : > { %1021 = vmatpush3.msra.mxu0 %v710_v11 }
 0x17f   : > { %1022 = vmatprep.subr.mxu0 %v1246_v0 }
 0x180   : > { %1023 = vmatpush3.msra.mxu0 %v709_v12 }
 0x181   : > { %1024 = vmatprep.subr.mxu0 %v1246_v0 }
 0x182   : > { %1025 = vmatpush3.msra.mxu0 %v708_v13 }
 0x183   : > { %1026 = vmatprep.subr.mxu0 %v1246_v0 }
 0x184   : > { %1027 = vmatpush3.msra.mxu0 %v707_v14 }
 0x185   : > { %1028 = vmatprep.subr.mxu0 %v1246_v0 }
 0x186   : > { %1029 = vmatpush3.msra.mxu0 %v706_v15 }
 0x234   : > { %v593_v17 = vpop.f32.mrf.mxu1 }
 0x235   : > { %v1479_v18 = vadd.f32 %v912_v16, %v593_v17 }
 0x236   : > { %v997_v19 = vpop.f32.mrf.mxu1 }
 0x237   : > { %v600_v20 = vand.u32 2139095040, %v1479_v18  ;;  %701 = vrot.lane.b32.xlu0 %v1479_v18, %s1248_s22  ;;  %v597_v0 = vand.u32 2147483647, %v1479_v18  ;;  %vm599_vm9 = vcmp.lt.s32.totalorder %v1479_v18, 0  ;;  %vm689_vm14 = vweird.f32 %v1479_v18  ;;  %s1172_s22 = scalar_lea.vmem %s815_s17, 128 }
 0x238   : > { %p1173_p10 = scmp.ne.s32.totalorder %s815_s17, %s1172_s22  ;;  %p1180_p0 = scmp.lt.s32.totalorder %s1178_s29, %s1172_s22 }
 0x239   : > { %v601_v22 = vshrl.u32 %v600_v20, 23  ;;  %v604_v28 = vand.u32 8388607, %v597_v0  ;;  %vm598_vm10 = vcmp.le.f32.partialorder %v597_v0, 0.7853982 }
 0x23a   : > { %p1174_p12 = pnand %p1173_p10, %p1334_p5  ;;  %p1181_p1 = por %p1180_p0, %p1179_p11 }
 0x23b   : > { %v913_v23 = vadd.s32 4294967169, %v601_v22  ;;  %v605_v46 = vor.u32 8388608, %v604_v28 }
 0x23c   : > { %p1175_p8 = pneg %p1174_p12 }
 0x23d   : > { %v607_v24 = vadd.s32 1, %v913_v23 }
 0x23e   : > { %p1182_p3 = pnand %p1181_p1, %p1175_p8 }
 0x23f   : > { %vm608_vm2 = vcmp.gt.s32.totalorder %v607_v24, 0 }
 0x240   : > { %v609_v25 = vsel %vm608_vm2, %v607_v24, 0 }
 0x241   : > { %v611_v26 = vand.u32 31, %v609_v25  ;;  %v610_v30 = vshrl.u32 %v609_v25, 5 }
 0x243   : > { %v612_v29 = vsub.s32 32, %v611_v26  ;;  %v614_v31 = vshll.u32 %v1249_v33, %v611_v26  ;;  %v617_v32 = vshll.u32 %v1250_v35, %v611_v26  ;;  %v620_v37 = vshll.u32 %v1251_v38, %v611_v26 }
 0x244   : > { %v623_v40 = vshll.u32 %v1252_v41, %v611_v26  ;;  %v626_v43 = vshll.u32 %v1253_v44, %v611_v26  ;;  %vm629_vm3 = vcmp.lt.s32.totalorder %v610_v30, 1  ;;  %vm632_vm4 = vcmp.lt.s32.totalorder %v610_v30, 4 }
 0x245   : > { %v615_v34 = vshrl.u32 %v1250_v35, %v612_v29  ;;  %v618_v36 = vshrl.u32 %v1251_v38, %v612_v29  ;;  %v621_v39 = vshrl.u32 %v1252_v41, %v612_v29  ;;  %v624_v42 = vshrl.u32 %v1253_v44, %v612_v29 }
 0x246   : > { %v627_v45 = vshrl.u32 %v1254_v47, %v612_v29  ;;  %v613_v54 = vshrl.u32 %v1249_v33, %v612_v29  ;;  %vm631_vm5 = vcmp.lt.s32.totalorder %v610_v30, 3  ;;  %vm630_vm6 = vcmp.lt.s32.totalorder %v610_v30, 2 }
 0x247   : > { %v616_v48 = vor.u32 %v615_v34, %v614_v31  ;;  %v619_v49 = vor.u32 %v618_v36, %v617_v32  ;;  %v622_v50 = vor.u32 %v621_v39, %v620_v37  ;;  %v625_v51 = vor.u32 %v624_v42, %v623_v40 }
 0x248   : > { %v628_v35 = vor.u32 %v627_v45, %v626_v43  ;;  %v645_v47 = vshll.u32 %v605_v46, 8 }
 0x249   : > { %v634_v52 = vsel %vm632_vm4, %v622_v50, 2102212464  ;;  %v637_v38 = vsel %vm629_vm3, %v616_v48, %v619_v49  ;;  %v641_v53 = vsel %vm629_vm3, %v619_v49, %v622_v50  ;;  %v638_v41 = vsel %vm632_vm4, %v625_v51, 920167782 }
 0x24a   : > { %v642_v55 = vsel %vm632_vm4, %v628_v35, 1326507024  ;;  %v639_v44 = vsel %vm631_vm5, %v622_v50, %v638_v41  ;;  %v633_v27 = vsel %vm629_vm3, %v613_v54, %v616_v48  ;;  %v635_v58 = vsel %vm631_vm5, %v619_v49, %v634_v52 }
 0x24b   : > { %v643_v57 = vsel %vm631_vm5, %v625_v51, %v642_v55  ;;  %v640_v59 = vsel %vm630_vm6, %v637_v38, %v639_v44  ;;  %v636_v2 = vsel %vm630_vm6, %v633_v27, %v635_v58  ;;  %v917_v38 = vld [vmem:[%s1568_s6] ss:$0 sm:$0xff] }
 0x24c   : > { %v644_v60 = vsel %vm630_vm6, %v641_v53, %v643_v57  ;;  %v1501_v63 = vmul.u32.u64.low %v645_v47, %v640_v59  ;;  %v1502_v1 = vmul.u32.u64.high %v645_v47, %v640_v59, %v1501_v63  ;;  %v652_v3 = vmul.u32 %v645_v47, %v636_v2 }
 0x24d   : > { %v1498_v61 = vmul.u32.u64.low %v645_v47, %v644_v60  ;;  %v1499_v62 = vmul.u32.u64.high %v645_v47, %v644_v60, %v1498_v61 }
 0x24e   : > { %v655_v33 = vadd.s32 1, %v1502_v1 }
 0x24f   : > { %vm654_vm7 = vc.u32 %v1499_v62, %v1501_v63  ;;  %v653_v17 = vadd.s32 %v1501_v63, %v1499_v62 }
 0x250   : > { %v656_v4 = vsel %vm654_vm7, %v655_v33, %v1502_v1 }
 0x251   : > { %v657_v5 = vadd.s32 %v656_v4, %v652_v3 }
 0x253   : > { %v658_v6 = vadd.s32 536870912, %v657_v5 }
 0x255   : > { %v659_v21 = vshrl.u32 %v658_v6, 30 }
 0x257   : > { %v660_v7 = vshll.u32 %v659_v21, 30  ;;  %v683_v32 = vsub.s32 4, %v659_v21 }
 0x259   : > { %v661_v8 = vsub.s32 %v657_v5, %v660_v7  ;;  %v684_v34 = vsel %vm599_vm9, %v683_v32, %v659_v21 }
 0x25a   : > { %v686_v36 = vsel %vm598_vm10, 0, %v684_v34 }
 0x25b   : > { %v663_v9 = vsub.s32 0, %v661_v8  ;;  %v690_v37 = vadd.s32 3, %v686_v36 }
 0x25d   : > { %v914_v10 = vmin.u32 %v663_v9, %v661_v8  ;;  %v691_v42 = vand.u32 3, %v690_v37 }
 0x25f   : > { %v665_v11 = vclz %v914_v10  ;;  %vm693_vm11 = vcmp.eq.s32.totalorder %v691_v42, 0  ;;  %vm696_vm12 = vcmp.eq.s32.totalorder %v691_v42, 2  ;;  %vm692_vm13 = vcmp.lt.s32.totalorder %v691_v42, 2 }
 0x261   : > { %v915_v12 = vadd.s32 4294967294, %v665_v11 }
 0x263   : > { %vm916_vm8 = vcmp.lt.s32.totalorder %v915_v12, 0 }
 0x264   : > { %v668_v13 = vsel %vm916_vm8, 0, %v915_v12 }
 0x265   : > { %v673_v14 = vsub.s32 4294967266, %v668_v13  ;;  %v669_v16 = vsub.s32 32, %v668_v13  ;;  %v670_v22 = vshll.u32 %v661_v8, %v668_v13 }
 0x267   : > { %v674_v15 = vadd.s32 127, %v673_v14  ;;  %v671_v20 = vshrl.u32 %v653_v17, %v669_v16 }
 0x269   : > { %v675_v19 = vshll.u32 %v674_v15, 23  ;;  %v672_v24 = vor.u32 %v671_v20, %v670_v22 }
 0x26b   : > { %v676_v23 = vor.u32 4788187, %v675_v19  ;;  %v679_v26 = vcvt.s32.f32 %v672_v24 }
 0x26d   : > { %v677_v25 = vand.u32 2147483647, %v676_v23 }
 0x26f   : > { %v680_v28 = vmul.f32 %v679_v26, %v677_v25 }
 0x271   : > { %v681_v29 = vxor.u32 2147483648, %v680_v28 }
 0x273   : > { %v682_v30 = vsel %vm599_vm9, %v681_v29, %v680_v28 }
 0x274   : > { %v685_v31 = vsel %vm598_vm10, %v1479_v18, %v682_v30 }
 0x275   : > { %1116 = vcosq.f32 %v685_v31 }
 0x276   : > { %1118 = vsinq.f32 %v685_v31 }
 0x282   : > { %v1117_v39 = vpop.eup %1116 }
 0x283   : > { %v1119_v40 = vpop.eup %1118  ;;  %v697_v45 = vxor.u32 2147483648, %v1117_v39 }
 0x284   : > { %v694_v43 = vxor.u32 2147483648, %v1119_v40 }
 0x285   : > { %v698_v48 = vsel %vm696_vm12, %v697_v45, %v1119_v40 }
 0x286   : > { %v695_v46 = vsel %vm693_vm11, %v1117_v39, %v694_v43 }
 0x287   : > { %v699_v0 = vsel %vm692_vm13, %v695_v46, %v698_v48 }
 0x288   : > { %v700_v51 = vsel %vm689_vm14, nan, %v699_v0 }
 0x2a9   : > { %v702_v49 = vpop.permute.xlu0 %701 }
 0x2aa   : > { %v703_v50 = vmul.f32 %v702_v49, %v1479_v18 }
 0x2ac   : > { %v704_v35 = vsel %vm307_vm15, %v700_v51, %v703_v50 }
 0x2ad   : > { %v705_v52 = vsel %vm306_vm0, %v1479_v18, %v704_v35 }
 0x2ae   : > { %1031 = vmatmul.mubr.f32.vlgmr.msra.gmra.mxu0 %v705_v52 }
 0x36e   : > { %v795_v53 = vpop.f32.mrf.mxu0 }
 0x36f   : > { %v796_v54 = vadd.f32 %v917_v38, %v795_v53 }
 0x370   : > { %v1032_v56 = vpop.f32.mrf.mxu0 }
 0x371   : > { %799 = vst [vmem:[%s299_s16] sm:$0xff] %v796_v54 }
 0x372   : > { %1185 = shalt.err (!%p1182_p3)
}
 0x373   : > { %s1186_s9 = scalar_lea.hbm %s1527_s20, 128  ;;  %s1190_s14 = scalar_lea.hbm %s1569_s7, 256 }
 0x374   : > { %p1187_p2 = scmp.ne.s32.totalorder %s1527_s20, %s1186_s9  ;;  %p1191_p7 = scmp.lt.s32.totalorder %s1527_s20, %s1569_s7 }
 0x375   : > { %p1192_p6 = scmp.lt.s32.totalorder %s1190_s14, %s1186_s9 }
 0x376   : > { %p1188_p4 = pnand %p1187_p2, %p1334_p5 }
 0x377   : > { %p1193_p9 = por %p1192_p6, %p1191_p7 }
 0x378   : > { %p1189_p13 = pneg %p1188_p4 }
 0x37a   : > { %p1194_p10 = pnand %p1193_p9, %p1189_p13 }
 0x37c   : > { %1197 = shalt.err (!%p1194_p10)
}
 0x37d   : > { %1049 = dma.vmem_to_hbm [thread:$0]  (%p1334_p5), %s815_s17, 128, %s1527_s20, %s801_s21  }
 0x37e PF: > { %p1066_p12 = scmp.ge.s32.totalorder %s1240_s27, 2  ;;  %s826_s18 = sand.u32 1, %s1228_s24  }
 0x37f   : > { %p1579_p8 = scmp.ne.s32.totalorder %s1572_s12, 0  ;;  %s827_s19 = scalar_lea.sflag [#allocation4], %s826_s18 }
 0x381   : > { %p1059_p11 = pnand %p1066_p12, %p1579_p8 }
 0x383   : > { %p1060_p0 = pneg %p1059_p11 }
 0x385   : > { %1223 = dma.done.wait (%p1060_p0), %s827_s19, 128  }
 0x386   : > { %1225 = vsyncadd (%p1060_p0), %s827_s19, 4294967168  ;;  %p19_p1 = scmp.ge.s32.totalorder %s1321_s30, 4   ;;  %s1580_s24 = smov %s1232_s25 }
 0x387   : > { %s1581_s25 = smov %s1236_s26  ;;  %s1582_s26 = smov %s1332_s10 }
 0x388   : > { %s1583_s27 = smov %s1321_s30  ;;  %21 = sbr.rel (!%p19_p1) target bundleno = 5 (0x5), region = 92 }
 0x38d   :  { %832 = vsyncpa [#allocation3], 1 }
 0x38e   :  { %834 = vsyncpa [#allocation3 + $0x1], 1 }
 0x38f   :  { %835 = vsyncpa [#allocation6], 1 }
 0x390   :  { %836 = vsyncpa [#allocation4], 1 }
 0x391   :  { %838 = vsyncpa [#allocation4 + $0x1], 1 }

</bundles_post_ra>
